<compile_context>
chip_gen: v5e
topology: v5e:2x2
jax: 0.10.0
libtpu: 0.0.40
codegen_flags: <defaults>
</compile_context>

<pallas_src>
import functools

import jax
import jax.numpy as jnp
from jax import lax
from jax.experimental import pallas as pl
from jax.experimental.pallas import tpu as pltpu

LANE = 128            # lane width (last dim of every tile)
SMALL_N = 1 << 20     # below this, plain XLA fused reduce wins over a pallas_call


def _round_up(x, m):
    return ((x + m - 1) // m) * m


def _hw_params():
    """(num_tensorcores_to_shard_over, max_tile_rows) for the local TPU generation."""
    try:
        kind = jax.devices()[0].device_kind.lower()
    except Exception:
        kind = ""
    if "v7" in kind:
        # 2 TCs per chip (megacore) and ~3.2 TB/s HBM: bigger tiles, shard reduction.
        return 2, 8192
    # v5e / v6e: single TensorCore per chip; a parallel axis would only add
    # a serial over-step + masking overhead, so keep it at 1.
    return 1, 4096


def _l2_sum_kernel(p_ref, g_ref, o_ref, acc_ref, *,
                   total_rows, tile_r, acc_r, inner, mask_start):
    """Accumulate sum((p - g)^2) into a (acc_r, LANE) VMEM accumulator."""
    c = pl.program_id(0)   # 'parallel' axis (megacore shard on v7x; size 1 otherwise)
    i = pl.program_id(1)   # 'arbitrary' reduction axis

    @pl.when(i == 0)
    def _init():
        acc_ref[...] = jnp.zeros_like(acc_ref)

    d = p_ref[...].astype(jnp.float32) - g_ref[...].astype(jnp.float32)
    sq = d * d

    def _fold(x):
        # Splits exactly on (acc_r, LANE) tile boundaries -> pure VPU vreg adds.
        # TODO(synk): confirm in the Mosaic MLIR that this reshape stays a view;
        # if a VMEM copy ever appears, switch to an unrolled pl.ds stripe loop.
        return jnp.sum(x.reshape(tile_r // acc_r, acc_r, LANE), axis=0)

    if mask_start is None:
        # No partial tiles and no over-steps: every step is the pure hot path.
        acc_ref[...] += _fold(sq)
    else:
        t = c * inner + i          # global (unclamped) row-tile index

        @pl.when(t < mask_start)
        def _interior():
            acc_ref[...] += _fold(sq)

        @pl.when(t >= mask_start)
        def _boundary():
            # Zero rows that fall beyond the real array (partial last tile or
            # clamped over-steps). Keep it a select so NaN/Inf in dead lanes
            # cannot propagate.
            row_ids = (lax.broadcasted_iota(jnp.int32, (tile_r, LANE), 0)
                       + t * tile_r)
            acc_ref[...] += _fold(jnp.where(row_ids < total_rows, sq, 0.0))

    @pl.when(i == pl.num_programs(1) - 1)
    def _finalize():
        o_ref[0, 0] = jnp.sum(acc_ref[...])   # single cross-lane reduce per core


def _l2_sum(prediction, ground_truth, force_pallas=False):
    assert prediction.shape == ground_truth.shape
    p = prediction.reshape(-1)
    g = ground_truth.reshape(-1)
    n = int(p.shape[0])

    if (not force_pallas) and n < SMALL_N:
        # Launch + pipeline setup dominates for tiny inputs; XLA's fused reduce wins.
        return jnp.sum(jnp.square(p.astype(jnp.float32) - g.astype(jnp.float32)))

    if n % LANE != 0:
        # TODO(synk): rare unaligned-tail path still copies via jnp.pad; a masked
        # lane-level tail would remove it, but typical NCHW sizes never hit this.
        pad = (-n) % LANE
        p = jnp.pad(p, (0, pad))
        g = jnp.pad(g, (0, pad))

    rows = p.shape[0] // LANE
    p2 = p.reshape(rows, LANE)
    g2 = g.reshape(rows, LANE)

    ncores, max_tile_r = _hw_params()

    itemsize = jnp.dtype(prediction.dtype).itemsize
    # Sub-32-bit dtypes pack along sublanes: keep the block row count a multiple
    # of the packed sublane tile (16 for bf16/f16, 32 for int8/fp8).
    sub_mult = {1: 32, 2: 16}.get(itemsize, 8)
    tile_r = min(max_tile_r, _round_up(rows, sub_mult))

    # Widest accumulator that divides the tile -> shortest dependent add chain.
    acc_r = 8
    for cand in (64, 32, 16):
        if tile_r % cand == 0:
            acc_r = cand
            break

    tiles = pl.cdiv(rows, tile_r)
    inner = pl.cdiv(tiles, ncores)
    total_steps = ncores * inner
    partial_last = (rows % tile_r) != 0

    if (not partial_last) and total_steps == tiles:
        mask_start = None                      # no masking anywhere
        in_map = lambda c, i: (c * inner + i, 0)
    else:
        # First global tile index that needs the row mask (partial last tile
        # and/or clamped over-steps past the real data).
        mask_start = (tiles - 1) if partial_last else tiles
        in_map = lambda c, i: (jnp.minimum(c * inner + i, tiles - 1), 0)

    kernel = functools.partial(
        _l2_sum_kernel,
        total_rows=rows, tile_r=tile_r, acc_r=acc_r,
        inner=inner, mask_start=mask_start)

    cost = pl.CostEstimate(
        flops=3 * n,                               # sub, mul, add per element
        transcendentals=0,
        bytes_accessed=2 * n * itemsize + ncores * 4)

    # 2 inputs x 2 pipeline buffers per input, plus headroom for acc/output.
    vmem_limit = int(min(max(4 * tile_r * LANE * itemsize * 2, 32 << 20), 64 << 20))

    partials = pl.pallas_call(
        kernel,
        out_shape=jax.ShapeDtypeStruct((ncores, 1), jnp.float32),
        grid_spec=pltpu.PrefetchScalarGridSpec(
            num_scalar_prefetch=0,
            grid=(ncores, inner),
            in_specs=[
                pl.BlockSpec((tile_r, LANE), in_map),
                pl.BlockSpec((tile_r, LANE), in_map),
            ],
            out_specs=pl.BlockSpec((1, 1), lambda c, i: (c, 0),
                                   memory_space=pltpu.SMEM),
            scratch_shapes=[pltpu.VMEM((acc_r, LANE), jnp.float32)],
        ),
        compiler_params=pltpu.CompilerParams(
            dimension_semantics=("parallel", "arbitrary"),
            vmem_limit_bytes=vmem_limit),
        cost_estimate=cost,
    )(p2, g2)

    return jnp.sum(partials)


def l2_restoration_loss(prediction, ground_truth, normalize=False, force_pallas=False):
    """Matches L2RestorationLoss.forward:
       sum((pred - gt)^2), optionally / (2 * pred.shape[1])."""
    total = _l2_sum(prediction, ground_truth, force_pallas=force_pallas)
    if normalize:
        normalization_constant = prediction.shape[1]
        return total / (2.0 * normalization_constant)
    return total


if __name__ == "__main__":
    key = jax.random.PRNGKey(0)
    k1, k2 = jax.random.split(key)

    # NCHW, small shapes: batch=2, channels=4, spatial=16x16
    pred = jax.random.normal(k1, (2, 4, 16, 16), dtype=jnp.float32)
    gt = jax.random.normal(k2, (2, 4, 16, 16), dtype=jnp.float32)

    # Default wrapper (small-n fast path).
    loss = l2_restoration_loss(pred, gt, normalize=False)
    loss_norm = l2_restoration_loss(pred, gt, normalize=True)

    # Explicitly exercise the Pallas kernel path at the same shapes.
    loss_pk = l2_restoration_loss(pred, gt, normalize=False, force_pallas=True)
    loss_pk_norm = l2_restoration_loss(pred, gt, normalize=True, force_pallas=True)

    jax.block_until_ready((loss, loss_norm, loss_pk, loss_pk_norm))

    # sanity check against plain JAX reference
    ref = jnp.sum(jnp.square(pred - gt))
    ref_norm = ref / (2.0 * pred.shape[1])
    assert jnp.allclose(loss, ref, rtol=1e-5, atol=1e-5)
    assert jnp.allclose(loss_norm, ref_norm, rtol=1e-5, atol=1e-5)
    assert jnp.allclose(loss_pk, ref, rtol=1e-5, atol=1e-5)
    assert jnp.allclose(loss_pk_norm, ref_norm, rtol=1e-5, atol=1e-5)

    print("KERNEL_OK")
</pallas_src>

<mosaic_0001>
module attributes {stable_mosaic.version = 11 : i64} {
  func.func @_l2_sum_kernel(%arg0: i32, %arg1: i32, %arg2: memref<16x128xf32, #tpu.memory_space<vmem>>, %arg3: memref<16x128xf32, #tpu.memory_space<vmem>>, %arg4: memref<1x1xf32, #tpu.memory_space<smem>>, %arg5: memref<16x128xf32, #tpu.memory_space<vmem>>) attributes {dimension_semantics = [#tpu.dimension_semantics<parallel>, #tpu.dimension_semantics<arbitrary>], iteration_bounds = array<i64: 1, 1>, scalar_prefetch = 0 : i64, scratch_operands = 1 : i64, tpu.core_type = #tpu.core_type<tc>, window_params = [{transform_indices = @transform_0, window_bounds = array<i64: 16, 128>}, {transform_indices = @transform_1, window_bounds = array<i64: 16, 128>}, {transform_indices = @transform_2, window_bounds = array<i64: 1, 1>}]} {
    %c0_i32 = arith.constant 0 : i32
    %0 = arith.cmpi eq, %arg1, %c0_i32 : i32
    %1 = arith.extui %0 : i1 to i32
    %c0_i32_0 = arith.constant 0 : i32
    %2 = arith.cmpi ne, %1, %c0_i32_0 : i32
    scf.if %2 {
      %cst_10 = arith.constant 0.000000e+00 : f32
      %15 = vector.broadcast %cst_10 : f32 to vector<16x128xf32>
      %c0_11 = arith.constant 0 : index
      %c0_12 = arith.constant 0 : index
      %16 = vector.load %arg5[%c0_11, %c0_12] : memref<16x128xf32, #tpu.memory_space<vmem>>, vector<16x128xf32>
      tpu.vector_store %arg5[%c0_11, %c0_12], %15 {strides = array<i32>} : memref<16x128xf32, #tpu.memory_space<vmem>>, vector<16x128xf32>,
    } else {
    }
    %c0 = arith.constant 0 : index
    %c0_1 = arith.constant 0 : index
    %3 = vector.load %arg2[%c0, %c0_1] : memref<16x128xf32, #tpu.memory_space<vmem>>, vector<16x128xf32>
    %c0_2 = arith.constant 0 : index
    %c0_3 = arith.constant 0 : index
    %4 = vector.load %arg3[%c0_2, %c0_3] : memref<16x128xf32, #tpu.memory_space<vmem>>, vector<16x128xf32>
    %5 = arith.subf %3, %4 : vector<16x128xf32>
    %6 = arith.mulf %5, %5 : vector<16x128xf32>
    %c0_4 = arith.constant 0 : index
    %c0_5 = arith.constant 0 : index
    %7 = vector.load %arg5[%c0_4, %c0_5] : memref<16x128xf32, #tpu.memory_space<vmem>>, vector<16x128xf32>
    %8 = vector.shape_cast %6 : vector<16x128xf32> to vector<1x16x128xf32>
    %cst = arith.constant dense<0.000000e+00> : vector<16x128xf32>
    %9 = vector.multi_reduction <add>, %8, %cst [0] : vector<1x16x128xf32> to vector<16x128xf32>
    %10 = arith.addf %7, %9 : vector<16x128xf32>
    %c0_6 = arith.constant 0 : index
    %c0_7 = arith.constant 0 : index
    %11 = vector.load %arg5[%c0_6, %c0_7] : memref<16x128xf32, #tpu.memory_space<vmem>>, vector<16x128xf32>
    tpu.vector_store %arg5[%c0_6, %c0_7], %10 {strides = array<i32>} : memref<16x128xf32, #tpu.memory_space<vmem>>, vector<16x128xf32>,
    %c0_i32_8 = arith.constant 0 : i32
    %12 = arith.cmpi eq, %arg1, %c0_i32_8 : i32
    %13 = arith.extui %12 : i1 to i32
    %c0_i32_9 = arith.constant 0 : i32
    %14 = arith.cmpi ne, %13, %c0_i32_9 : i32
    scf.if %14 {
      %c0_10 = arith.constant 0 : index
      %c0_11 = arith.constant 0 : index
      %15 = vector.load %arg5[%c0_10, %c0_11] : memref<16x128xf32, #tpu.memory_space<vmem>>, vector<16x128xf32>
      %16 = vector.shape_cast %15 : vector<16x128xf32> to vector<1x16x128xf32>
      %cst_12 = arith.constant dense<0.000000e+00> : vector<1xf32>
      %17 = vector.multi_reduction <add>, %16, %cst_12 [1, 2] : vector<1x16x128xf32> to vector<1xf32>
      %18 = vector.shape_cast %17 : vector<1xf32> to vector<1x1x1xf32>
      %19 = vector.extract %18[0, 0, 0] : f32 from vector<1x1x1xf32>
      %c0_13 = arith.constant 0 : index
      %c0_14 = arith.constant 0 : index
      %20 = memref.load %arg4[%c0_13, %c0_14] : memref<1x1xf32, #tpu.memory_space<smem>>
      memref.store %19, %arg4[%c0_13, %c0_14] : memref<1x1xf32, #tpu.memory_space<smem>>
    } else {
    }
    return
  }
  func.func @transform_0(%arg0: i32, %arg1: i32) -> (i32, i32) {
    %c1_i32 = arith.constant 1 : i32
    %0 = arith.muli %arg0, %c1_i32 : i32
    %1 = arith.addi %0, %arg1 : i32
    %c0_i32 = arith.constant 0 : i32
    %c0_i32_0 = arith.constant 0 : i32
    return %1, %c0_i32 : i32, i32
  }
  func.func @transform_1(%arg0: i32, %arg1: i32) -> (i32, i32) {
    %c1_i32 = arith.constant 1 : i32
    %0 = arith.muli %arg0, %c1_i32 : i32
    %1 = arith.addi %0, %arg1 : i32
    %c0_i32 = arith.constant 0 : i32
    %c0_i32_0 = arith.constant 0 : i32
    return %1, %c0_i32 : i32, i32
  }
  func.func @transform_2(%arg0: i32, %arg1: i32) -> (i32, i32) {
    %c0_i32 = arith.constant 0 : i32
    %c0_i32_0 = arith.constant 0 : i32
    return %arg0, %c0_i32 : i32, i32
  }
}

</mosaic_0001>

<bundles_post_ra>
// kernel: tpu_custom_call.1
= control target key start
LH: loop header
LB: loop body
LE: loop exit
PB: predicated region body
PF: predicated region fallthrough
CT: control target
= control target key end

     0   :  { %7 = vsyncpa [#allocation4], 0  ;;  %s214_s0 = inlined_call_operand.hbm [shape: f32[16,128], index: 0, kind: input, shape index: {}]   ;;  %s215_s1 = inlined_call_operand.hbm [shape: f32[16,128], index: 1, kind: input, shape index: {}]   ;;  %s216_s2 = inlined_call_operand.hbm [shape: f32[1,1], index: 2, kind: output, shape index: {}]  }
   0x1   :  { %8 = vsyncpa [#allocation7], 0 }
   0x2   :  { %9 = vsyncpa [#allocation5], 0  ;;  %s18_s11 = sshll.u32 %s214_s0, 4  ;;  %s185_s12 = smov [#allocation3]   ;;  %s19_s11 = int_to_ptr.hbm [resolvable:$true] %s18_s11 }
   0x3   :  { %s20_s13 = sshll.u32 %s185_s12, 4  ;;  %s35_s16 = sshll.u32 %s215_s1, 4  ;;  %s21_s13 = int_to_ptr.vmem [resolvable:$true] %s20_s13  ;;  %s36_s16 = int_to_ptr.hbm [resolvable:$true] %s35_s16 }
   0x4   :  { %s186_s17 = smov 128   ;;  %s187_s18 = smov 8  }
   0x5   :  { %26 = dma.hbm_to_vmem [thread:$0]  %s19_s11, 256, %s21_s13, [#allocation4], %s186_s17, %s186_s17, %s187_s18  }
   0x6   :  { %s188_s19 = smov [#allocation6]  }
   0x7   :  { %s37_s20 = sshll.u32 %s188_s19, 4  ;;  %s38_s20 = int_to_ptr.vmem [resolvable:$true] %s37_s20 }
   0x8   :  { %43 = dma.hbm_to_vmem [thread:$0]  %s36_s16, 256, %s38_s20, [#allocation7], %s186_s17, %s186_s17, %s187_s18  }
   0x9   :  { %179 = dma.done.wait [#allocation4], 256  }
   0xa   :  { %180 = vsyncadd [#allocation4], 4294967040 }
   0xb   :  { %181 = dma.done.wait [#allocation7], 256  }
   0xc   :  { %182 = vsyncadd [#allocation7], 4294967040  ;;  %v62_v0 = vld [vmem:[#allocation3] sm:$0xff]  ;;  %v63_v1 = vld [vmem:[#allocation3 + $0x8] sm:$0xff]  ;;  %s100_s21 = sshll.u32 %s216_s2, 4  ;;  %s189_s23 = smov [#allocation8]   ;;  %s101_s21 = int_to_ptr.hbm [resolvable:$true] %s100_s21 }
   0xd   :  { %v64_v2 = vld [vmem:[#allocation6] sm:$0xff]  ;;  %v65_v3 = vld [vmem:[#allocation6 + $0x8] sm:$0xff] }
   0xe   :  { %v66_v4 = vsub.f32 %v62_v0, %v64_v2  ;;  %v67_v5 = vsub.f32 %v63_v1, %v65_v3 }
  0x10   :  { %v68_v6 = vmul.f32 %v66_v4, %v66_v4  ;;  %v69_v7 = vmul.f32 %v67_v5, %v67_v5 }
  0x12   :  { %v83_v8 = vadd.f32 %v69_v7, %v68_v6 }
  0x14   :  { %84 = vadd.xlane.f32.xlu0 %v83_v8 }
  0x87   :  { %v85_v9 = vpop.xlane.xlu0 %84 }
  0x88   :  { %v86_v10 = vrot.slane %v85_v9, 4 }
  0x8a   :  { %v87_v11 = vadd.f32 %v86_v10, %v85_v9 }
  0x8c   :  { %v88_v12 = vrot.slane %v87_v11, 2 }
  0x8e   :  { %v89_v13 = vadd.f32 %v88_v12, %v87_v11 }
  0x90   :  { %v90_v14 = vrot.slane %v89_v13, 1 }
  0x92   :  { %v91_v15 = vadd.f32 %v90_v14, %v89_v13 }
  0x94   :  { %112 = vpush %v91_v15 }
  0xc5   :  { %s113_s22 = spop %112 }
  0xc6   :  { %94 = sst [smem:[#allocation8]] %s113_s22 }
  0xc7   :  { %103 = dma.smem_to_hbm %s189_s23, 16, %s101_s21, [#allocation5]  }
  0xc8   :  { %183 = dma.done.wait [#allocation5], 16  }
  0xc9   :  { %184 = vsyncadd [#allocation5], 4294967280 }
  0xca   :  { %108 = sfence }
  0xcb   :  { %109 = vsyncpa [#allocation4], 1 }
  0xcc   :  { %110 = vsyncpa [#allocation7], 1 }
  0xcd   :  { %111 = vsyncpa [#allocation5], 1 }

</bundles_post_ra>
